<compile_context>
chip_gen: v7x
topology: tpu7x:2x2x1
jax: 0.10.0
libtpu: 0.0.40
codegen_flags: <defaults>
</compile_context>

<pallas_src>
import jax
import jax.numpy as jnp
from jax.experimental import pallas as pl
from jax.experimental.pallas import tpu as pltpu


def _conf_head_kernel(x_ref, w_ref, b_ref, o_ref):
    # x_ref: (Cin, T)   -- spatial tile, lane-dense
    # w_ref: (Cout, Cin), b_ref: (Cout, 1), o_ref: (Cout, T)
    acc = jnp.dot(w_ref[...], x_ref[...], preferred_element_type=jnp.float32)
    o_ref[...] = (acc + b_ref[...]).astype(o_ref.dtype)


def _pick_tile_hw(hw, cin, vmem_budget_bytes=6 * 1024 * 1024):
    """Largest lane-aligned spatial tile whose double-buffered input block stays
    within a conservative VMEM budget (fits v5e's 16 MiB scoped default)."""
    max_tile = vmem_budget_bytes // (2 * 4 * max(cin, 1))  # 2 buffers, 4 B/elem
    max_tile = max(128, min(4096, (max_tile // 128) * 128))
    if hw <= max_tile:
        return hw
    for t in range(max_tile, 127, -128):  # prefer a lane-aligned divisor of HW
        if hw % t == 0:
            return t
    return max_tile  # last tile is partial; Pallas masks the out-of-bounds region


def conf_head_forward(x_nchw, weight, bias, num_anchors=3, num_classes=2):
    """Equivalent of ConfHead.forward.

    x_nchw : (N, Cin, H, W)
    weight : (Cout, Cin) or (Cout, Cin, 1, 1)  with Cout = num_anchors * num_classes
    bias   : (Cout,)
    returns: (N, H*W*num_anchors, num_classes)
    """
    N, Cin, H, W = x_nchw.shape
    Cout = weight.shape[0]
    HW = H * W

    x3d = x_nchw.reshape(N, Cin, HW)        # free reshape, stays NCHW in HBM
    w2d = weight.reshape(Cout, Cin)
    b2d = bias.reshape(Cout, 1)

    tile = _pick_tile_hw(HW, Cin)
    grid = (N, pl.cdiv(HW, tile))

    cost = pl.CostEstimate(
        flops=2 * N * HW * Cin * Cout,
        transcendentals=0,
        bytes_accessed=4 * (N * Cin * HW + Cout * Cin + Cout + N * Cout * HW),
    )

    out_chw = pl.pallas_call(
        _conf_head_kernel,
        out_shape=jax.ShapeDtypeStruct((N, Cout, HW), x_nchw.dtype),
        grid=grid,
        in_specs=[
            # activation: read straight from NCHW, spatial tile on lanes
            pl.BlockSpec((None, Cin, tile), lambda n, t: (n, 0, t)),
            # weight / bias: constant index_map -> stay resident in VMEM
            pl.BlockSpec((Cout, Cin), lambda n, t: (0, 0)),
            pl.BlockSpec((Cout, 1), lambda n, t: (0, 0)),
        ],
        out_specs=pl.BlockSpec((None, Cout, tile), lambda n, t: (n, 0, t)),
        compiler_params=pltpu.CompilerParams(
            dimension_semantics=("parallel", "parallel")),
        cost_estimate=cost,
    )(x3d, w2d, b2d)

    # out.permute(0, 2, 3, 1).view(N, -1, num_classes): cheap permute/reshape on
    # the tiny (N, Cout, HW) conv output (Cout = num_anchors * num_classes).
    out_nhwc = jnp.transpose(out_chw, (0, 2, 1))            # (N, HW, Cout)
    return out_nhwc.reshape(N, HW * num_anchors, num_classes)


if __name__ == "__main__":
    # Small, module-consistent shapes: batch=2, inchannels=32, spatial=16x16,
    # num_anchors=3, num_classes=2 -> conv output channels = 6.
    N, Cin, H, W = 2, 32, 16, 16
    num_anchors, num_classes = 3, 2
    Cout = num_anchors * num_classes

    key = jax.random.PRNGKey(0)
    kx, kw, kb = jax.random.split(key, 3)

    x = jax.random.normal(kx, (N, Cin, H, W), dtype=jnp.float32)
    weight = jax.random.normal(kw, (Cout, Cin), dtype=jnp.float32) * 0.05
    bias = jax.random.normal(kb, (Cout,), dtype=jnp.float32) * 0.05

    out = conf_head_forward(x, weight, bias,
                            num_anchors=num_anchors, num_classes=num_classes)
    out = jax.block_until_ready(out)

    # Reference check in plain JAX (same math as the PyTorch module).
    ref = jnp.einsum("oc,nchw->nhwo", weight, x,
                     precision=jax.lax.Precision.HIGHEST) + bias
    ref = ref.reshape(N, H * W * num_anchors, num_classes)

    assert out.shape == (N, H * W * num_anchors, num_classes), out.shape
    assert jnp.allclose(out, ref, atol=1e-3, rtol=1e-3), \
        float(jnp.max(jnp.abs(out - ref)))

    print("KERNEL_OK")
</pallas_src>

<mosaic_0001>
module attributes {stable_mosaic.version = 11 : i64} {
  func.func @_conf_head_kernel(%arg0: i32, %arg1: i32, %arg2: memref<1x32x256xf32, #tpu.memory_space<vmem>>, %arg3: memref<6x32xf32, #tpu.memory_space<vmem>>, %arg4: memref<6x1xf32, #tpu.memory_space<vmem>>, %arg5: memref<1x6x256xf32, #tpu.memory_space<vmem>>) attributes {dimension_semantics = [#tpu.dimension_semantics<parallel>, #tpu.dimension_semantics<parallel>], iteration_bounds = array<i64: 2, 1>, scalar_prefetch = 0 : i64, scratch_operands = 0 : i64, tpu.core_type = #tpu.core_type<tc>, window_params = [{transform_indices = @transform_0, window_bounds = array<i64: 1, 32, 256>}, {pipeline_mode = #tpu.pipeline_mode<synchronous>, transform_indices = @transform_1, window_bounds = array<i64: 6, 32>}, {pipeline_mode = #tpu.pipeline_mode<synchronous>, transform_indices = @transform_2, window_bounds = array<i64: 6, 1>}, {transform_indices = @transform_3, window_bounds = array<i64: 1, 6, 256>}]} {
    %c0 = arith.constant 0 : index
    %c0_0 = arith.constant 0 : index
    %0 = vector.load %arg3[%c0, %c0_0] : memref<6x32xf32, #tpu.memory_space<vmem>>, vector<6x32xf32>
    %c0_1 = arith.constant 0 : index
    %c0_2 = arith.constant 0 : index
    %c0_3 = arith.constant 0 : index
    %1 = vector.load %arg2[%c0_1, %c0_2, %c0_3] : memref<1x32x256xf32, #tpu.memory_space<vmem>>, vector<1x32x256xf32>
    %2 = vector.shape_cast %1 : vector<1x32x256xf32> to vector<32x256xf32>
    %cst = arith.constant dense<0.000000e+00> : vector<6x256xf32>
    %3 = tpu.matmul %0, %2, %cst {dimension_numbers = #tpu.dot_dimension_numbers<[1], [0], [0], [1], [0, 0, 1, 1], [], []>} : vector<6x32xf32>, vector<32x256xf32>, vector<6x256xf32> -> vector<6x256xf32>
    %c0_4 = arith.constant 0 : index
    %c0_5 = arith.constant 0 : index
    %4 = vector.load %arg4[%c0_4, %c0_5] : memref<6x1xf32, #tpu.memory_space<vmem>>, vector<6x1xf32>
    %5 = vector.broadcast %4 : vector<6x1xf32> to vector<6x256xf32>
    %6 = arith.addf %3, %5 : vector<6x256xf32>
    %c0_6 = arith.constant 0 : index
    %c0_7 = arith.constant 0 : index
    %c0_8 = arith.constant 0 : index
    %7 = vector.load %arg5[%c0_6, %c0_7, %c0_8] : memref<1x6x256xf32, #tpu.memory_space<vmem>>, vector<1x6x256xf32>
    %8 = vector.shape_cast %7 : vector<1x6x256xf32> to vector<6x256xf32>
    %9 = vector.shape_cast %6 : vector<6x256xf32> to vector<1x6x256xf32>
    tpu.vector_store %arg5[%c0_6, %c0_7, %c0_8], %9 {strides = array<i32>} : memref<1x6x256xf32, #tpu.memory_space<vmem>>, vector<1x6x256xf32>,
    return
  }
  func.func @transform_0(%arg0: i32, %arg1: i32) -> (i32, i32, i32) {
    %c0_i32 = arith.constant 0 : i32
    %c0_i32_0 = arith.constant 0 : i32
    return %arg0, %c0_i32, %arg1 : i32, i32, i32
  }
  func.func @transform_1(%arg0: i32, %arg1: i32) -> (i32, i32) {
    %c0_i32 = arith.constant 0 : i32
    %c0_i32_0 = arith.constant 0 : i32
    %c0_i32_1 = arith.constant 0 : i32
    return %c0_i32, %c0_i32_0 : i32, i32
  }
  func.func @transform_2(%arg0: i32, %arg1: i32) -> (i32, i32) {
    %c0_i32 = arith.constant 0 : i32
    %c0_i32_0 = arith.constant 0 : i32
    %c0_i32_1 = arith.constant 0 : i32
    return %c0_i32, %c0_i32_0 : i32, i32
  }
  func.func @transform_3(%arg0: i32, %arg1: i32) -> (i32, i32, i32) {
    %c0_i32 = arith.constant 0 : i32
    %c0_i32_0 = arith.constant 0 : i32
    return %arg0, %c0_i32, %arg1 : i32, i32, i32
  }
}

</mosaic_0001>

<bundles_post_ra>
// kernel: tpu_custom_call.1
= control target key start
LH: loop header
LB: loop body
LE: loop exit
PB: predicated region body
PF: predicated region fallthrough
CT: control target
= control target key end

     0   :  { %8 = vsyncpa [#allocation3], 0  ;;  %s727_s0 = inlined_call_operand.hbm [shape: f32[2,32,256], index: 0, kind: input, shape index: {}]   ;;  %s728_s1 = inlined_call_operand.vmem [shape: f32[6,32], index: 1, kind: input, shape index: {}]   ;;  %s729_s2 = inlined_call_operand.vmem [shape: f32[6,1], index: 2, kind: input, shape index: {}]   ;;  %s730_s3 = inlined_call_operand.vmem [shape: f32[2,6,256], index: 3, kind: output, shape index: {}]  }
   0x1   :  { %10 = vsyncpa [#allocation3 + $0x1], 0  ;;  %s597_s12 = smov 0   ;;  %s599_s13 = smov 0  }
   0x2   :  { %s601_s14 = smov 0   ;;  %s603_s15 = smov 0  }
   0x3   :  { %s605_s16 = smov 0   ;;  %s607_s17 = smov 0  }
   0x4 LB: > { %s406_s18 = sadd.s32 4294967295, %s570_s17   ;;  %s28_s19 = sadd.s32 1, %s566_s16  ;;  %s570_s17 = sphi %s607_s17, %s16_s17   ;;  %s566_s16 = sphi %s605_s16, %s738_s16   ;;  %s562_s15 = sphi %s603_s15, %s737_s15   ;;  %s558_s14 = sphi %s601_s14, %s736_s14   ;;  %s554_s13 = sphi %s599_s13, %s735_s13   ;;  %s550_s12 = sphi %s597_s12, %s734_s12  }
   0x5   : > { %p30_p0 = scmp.ge.s32.totalorder %s28_s19, 2  ;;  %s37_s20 = sadd.s32 1, %s558_s14 }
   0x6   : > { %p44_p1 = scmp.ne.s32.totalorder %s558_s14, %s554_s13  ;;  %p45_p2 = scmp.eq.s32.totalorder %s570_s17, 0 }
   0x7   : > { %s740_s19 = smov (%p30_p0, %s28_s19), 0  ;;  %p50_p4 = scmp.ne.s32.totalorder %s554_s13, %s550_s12 }
   0x8   : > { %p633_p3 = por %p45_p2, %p44_p1  ;;  %s32_s22 = ssub.s32 %s566_s16, %s740_s19 }
   0x9   : > { %p51_p5 = scmp.eq.s32.totalorder %s406_s18, 0  ;;  %p35_p6 = scmp.eq.s32.totalorder %s32_s22, 0 }
   0xa   : > { %p436_p8 = scmp.lt.s32.totalorder %s570_s17, 2  ;;  %s150_s25 = sand.u32 1, %s558_s14  }
   0xb   : > { %p640_p7 = por %p51_p5, %p50_p4  ;;  %s420_s26 = sshll.u32 %s566_s16, 10 }
   0xc   : > { %s646_s24 = scalar_select %p35_p6, %s558_s14, %s37_s20  }
   0xd   : > { %s410_s27 = sshll.u32 %s150_s25, 6  ;;  %s653_s30 = scalar_lea.hbm %s727_s0, %s420_s26 }
   0xe   : > { %s154_s4 = scalar_lea.vmem [#allocation2], %s410_s27  ;;  %p657_p9 = pnand %p436_p8, %p633_p3 }
   0xf   : > { %s163_s5 = sshll.u32 %s154_s4, 4  ;;  %s663_s7 = scalar_lea.sflag [#allocation3], %s150_s25  ;;  %s661_s5 = int_to_ptr.vmem [resolvable:$true] %s163_s5 }
  0x10   : > { %s490_s8 = scalar_lea.hbm %s653_s30, 1024  ;;  %p492_p11 = pneg %p657_p9 }
  0x11   : > { %p491_p10 = scmp.ne.s32.totalorder %s653_s30, %s490_s8  ;;  %s495_s11 = scalar_lea.hbm %s727_s0, 2048 }
  0x12   : > { %p496_p0 = scmp.lt.u32.totalorder %s653_s30, %s727_s0  ;;  %p497_p1 = scmp.lt.u32.totalorder %s495_s11, %s490_s8 }
  0x13   : > { %p493_p12 = pnand %p492_p11, %p491_p10  ;;  %p499_p3 = scmp.lt.u32.totalorder %s490_s8, %s653_s30 }
  0x14   : > { %p498_p2 = por %p497_p1, %p496_p0 }
  0x15   : > { %p494_p13 = pneg %p493_p12 }
  0x16   : > { %p500_p4 = por %p499_p3, %p498_p2 }
  0x18   : > { %p501_p5 = pnand %p500_p4, %p494_p13 }
  0x1a   : > { %504 = shalt.err (!%p501_p5)
}
  0x1b   : > { %s505_s20 = scalar_lea.vmem %s661_s5, 1024  ;;  %s572_s21 = smov [#allocation2]  }
  0x1c   : > { %p506_p6 = scmp.ne.s32.totalorder %s661_s5, %s505_s20  ;;  %s510_s22 = sshll.u32 %s572_s21, 4  ;;  %s511_s22 = int_to_ptr.vmem [resolvable:$false] %s510_s22 }
  0x1d   : > { %s512_s25 = scalar_lea.vmem %s511_s22, 2048  ;;  %p513_p12 = scmp.lt.s32.totalorder %s661_s5, %s511_s22 }
  0x1e   : > { %p508_p8 = pnand %p506_p6, %p492_p11  ;;  %p514_p0 = scmp.lt.s32.totalorder %s512_s25, %s505_s20 }
  0x20   : > { %p509_p10 = pneg %p508_p8  ;;  %p515_p1 = por %p514_p0, %p513_p12 }
  0x22   : > { %p516_p2 = pnand %p515_p1, %p509_p10 }
  0x24   : > { %519 = shalt.err (!%p516_p2)
}
  0x25   : > { %s573_s26 = smov 256   ;;  %s574_s27 = smov 16  }
  0x26   : > { %435 = dma.hbm_to_vmem [thread:$0]  (!%p657_p9), %s653_s30, 1024, %s661_s5, %s663_s7, %s573_s26, %s573_s26, %s574_s27  }
  0x27   : > { %p413_p11 = scmp.ge.s32.totalorder %s570_s17, 1  ;;  %p171_p13 = scmp.lt.s32.totalorder %s570_s17, 3 }
  0x29   : > { %p172_p3 = pnand %p413_p11, %p171_p13 }
  0x2a   : > { %s177_s28 = sand.u32 (!%p172_p3), 1, %s554_s13  }
  0x2b   : > { %175 = sbr.rel (%p172_p3) target bundleno = 278 (0x116), region = 32  ;;  %s414_s29 = sshll.u32 (!%p172_p3), %s177_s28, 6 }
  0x2c   : > { %s178_s4 = scalar_lea.sflag (!%p172_p3), [#allocation3], %s177_s28  ;;  %s181_s8 = scalar_lea.vmem (!%p172_p3), [#allocation2], %s414_s29 }
  0x32   : > { %545 = dma.done.wait (%p640_p7), %s178_s4, 1024  }
  0x33   : > { %547 = vsyncadd (%p640_p7), %s178_s4, 4294966272  ;;  %v575_v0 = vmov 0.0   ;;  %v576_v1 = vmov 0   ;;  %v221_v2 = vld [vmem:[%s181_s8 + $0x8] sm:$0xff]  ;;  %v223_v3 = vld [vmem:[%s181_s8 + $0x18] sm:$0xff]  ;;  %vm234_vm0 = vcmask 261120  }
  0x34   : > { %302 = vmatprep.mubr.f32.mxu0 %v575_v0  ;;  %489 = vset.pattern.permute.xlu0 %v576_v1  ;;  %v220_v4 = vld [vmem:[%s181_s8] sm:$0xff]  ;;  %v422_v5 = vpack.c.bf16 %v223_v3, %v221_v2  ;;  %v222_v6 = vld [vmem:[%s181_s8 + $0x10] sm:$0xff]  ;;  %v225_v7 = vld [vmem:[%s181_s8 + $0x28] sm:$0xff]  ;;  %p210_p7 = scmp.lt.s32.totalorder %s562_s15, 1 }
  0x35   : > { %v227_v8 = vld [vmem:[%s181_s8 + $0x38] sm:$0xff]  ;;  %v424_v9 = vpack.c.bf16 %v222_v6, %v220_v4  ;;  %v224_v11 = vld [vmem:[%s181_s8 + $0x20] sm:$0xff]  ;;  %v226_v12 = vld [vmem:[%s181_s8 + $0x30] sm:$0xff] }
  0x36   : > { %v426_v10 = vpack.c.bf16 %v227_v8, %v225_v7  ;;  %423 = vmatprep.subr.bf16.mxu0 %v422_v5  ;;  %v228_v13 = vld [vmem:[%s729_s2] sm:$0x3f]  ;;  %v428_v14 = vpack.c.bf16 %v226_v12, %v224_v11  ;;  %s742_s15 = smov (!%p210_p7, %s562_s15), 1 }
  0x37   : > { %425 = vmatpush1.bf16.msra.mxu0 %v424_v9  ;;  %231 = vperm.xlu0 %489, %v228_v13   ;;  %v219_v15 = vld [vmem:[%s728_s1] sm:$0x3f]  ;;  %s421_s7 = sshll.u32 %s742_s15, 4 }
  0x38   : > { %427 = vmatprep.subr.bf16.mxu0 %v426_v10  ;;  %s217_s11 = scalar_lea.vmem %s730_s3, %s421_s7 }
  0x3b   : > { %429 = vmatpush1.bf16.msra.mxu0 %v428_v14 }
  0x3e   : > { %417 = vmatmul.mubr.msk.f32.vlgmr.msra.gmra.mrb[0].mxu0 %vm234_vm0, %v219_v15 }
  0xb6   : > { %v232_v16 = vpop.permute.xlu0 %231 }
 0x111   : > { %v304_v17 = vpop.f32.mrb[0].mxu0 }
 0x112   : > { %v305_v18 = vadd.f32 %v304_v17, %v232_v16  ;;  %v306_v19 = vpop.f32.mrb[1].mxu0 }
 0x113   : > { %v307_v20 = vadd.f32 %v306_v19, %v232_v16 }
 0x114   : > { %309 = vst [vmem:[%s217_s11] sm:$0x3f] %v305_v18 }
 0x115   : > { %310 = vst [vmem:[%s217_s11 + $0x8] sm:$0x3f] %v307_v20 }
 0x116 PF: > { %s16_s17 = sadd.s32 1, %s570_s17   ;;  %s734_s12 = smov %s554_s13 }
 0x117   : > { %p13_p9 = scmp.ge.s32.totalorder %s16_s17, 4   ;;  %s735_s13 = smov %s558_s14 }
 0x118   : > { %s736_s14 = smov %s646_s24  ;;  %s737_s15 = smov %s566_s16 }
 0x119   : > { %s738_s16 = smov %s740_s19  ;;  %15 = sbr.rel (!%p13_p9) target bundleno = 4 (0x4), region = 72 }
 0x120   :  { %341 = vsyncpa [#allocation3], 1 }
 0x121   :  { %343 = vsyncpa [#allocation3 + $0x1], 1 }

</bundles_post_ra>
